<compile_context>
chip_gen: v7x
topology: tpu7x:2x2x1
jax: 0.10.0
libtpu: 0.0.40
codegen_flags: <defaults>
</compile_context>

<pallas_src>
import functools

import jax
import jax.numpy as jnp
from jax.experimental import pallas as pl
from jax.experimental.pallas import tpu as pltpu


# ----------------------------------------------------------------------------
# Pallas kernel: fused conditioned-velocity MLP
#   h_pre = x@W1x + z@W1z + t*W1t + b1     (bf16 MXU, f32 acc; t-term f32 VPU)
#   out   = tanh(h_pre) @ W2 + b2          (sign from `reverse` folded into W2/b2)
# ----------------------------------------------------------------------------
def _velocity_kernel(x_ref, z_ref, t_ref, w1x_ref, w1z_ref, w1t_ref, b1_ref,
                     w2_ref, b2_ref, o_ref):
    # In-kernel f32 -> bf16 casts (VPU) — the wrapper never stages a slab in HBM.
    x_bf = x_ref[...].astype(jnp.bfloat16)
    z_bf = z_ref[...].astype(jnp.bfloat16)
    # Two MXU pushes with f32 accumulation (mem-bound kernel: extra push is free).
    h_pre = jnp.dot(x_bf, w1x_ref[...], preferred_element_type=jnp.float32)
    h_pre = h_pre + jnp.dot(z_bf, w1z_ref[...], preferred_element_type=jnp.float32)
    # Time conditioning + bias as an f32 broadcast-FMA on the VPU (t stays f32).
    h_pre = h_pre + t_ref[...] * w1t_ref[...] + b1_ref[...]
    h1 = jnp.tanh(h_pre).astype(jnp.bfloat16)            # EUP tanh, back to bf16
    out = jnp.dot(h1, w2_ref[...], preferred_element_type=jnp.float32) + b2_ref[...]
    o_ref[...] = out.astype(o_ref.dtype)


def _pick_tb(B):
    """Batch-tile heuristic (mem-bound kernel).

    Tiny B: one grid step (block == full batch) beats the ~0.35 us/step overhead.
    Large B: biggest tile in [64, 1024] that still leaves >= 4 grid steps, so the
    v7x megacore gets >= 2 pipelined steps per TensorCore (DMA/compute overlap);
    pipeline efficiency saturates around 512-wide tiles anyway.
    """
    if B <= 256:
        return B
    for cand in (1024, 512, 256, 128, 64):
        if B % cand == 0 and B // cand >= 4:
            return cand
    return 256  # non-divisible batch: wrapper pads to a multiple of 256


def _vmem_limit_bytes(tb, D, Z, H, out_bytes):
    """Explicit scoped-VMEM limit (v5e default is only 16 MiB; v7x phys 64 MiB)."""
    acts = 2 * tb * (4 * D + 4 * Z + 4)          # x/z/t f32 tiles, double-buffered
    outs = 2 * tb * D * out_bytes                # output tile, double-buffered
    wgts = 2 * (2 * D * H + 2 * Z * H + 4 * H + 4 * H + 2 * H * D + 4 * D)
    budget = 2 * (acts + outs + wgts) + (4 << 20)   # 2x slack + internal scratch
    return int(min(max(budget, 16 << 20), 64 << 20))


def prepare_velocity_params(params, *, reverse=False):
    """Cast matmul weights to bf16 and fold the reverse sign once (exact)."""
    sign = -1.0 if reverse else 1.0
    return {
        "w1x": params["w1x"].astype(jnp.bfloat16),         # (D, H)
        "w1z": params["w1z"].astype(jnp.bfloat16),         # (Z, H)
        "w1t": params["w1t"].astype(jnp.float32),          # (1, H) kept f32
        "b1":  params["b1"].astype(jnp.float32),           # (1, H) kept f32
        "w2":  (sign * params["w2"]).astype(jnp.bfloat16),  # (H, D) sign folded
        "b2":  (sign * params["b2"]).astype(jnp.float32),   # (1, D) sign folded
    }


@functools.partial(jax.jit, static_argnames=("tb", "out_dtype"))
def velocity_model_pallas(x, t, z, fused, *, tb=None, out_dtype=jnp.bfloat16):
    """Fused Pallas forward: x [B,D] f32, t [B,1] f32, z [B,Z] f32 -> [B,D]."""
    B, D = x.shape
    Z = z.shape[-1]
    H = fused["w1x"].shape[-1]
    assert fused["w2"].shape == (H, D), "weight / input feature mismatch"

    if tb is None:
        tb = _pick_tb(B)

    # Pad the batch up to a tile multiple (zero tail rows, sliced off below).
    Bp = pl.cdiv(B, tb) * tb
    if Bp != B:
        pad = ((0, Bp - B), (0, 0))
        x, z, t = jnp.pad(x, pad), jnp.pad(z, pad), jnp.pad(t, pad)

    grid = (Bp // tb,)
    out_bytes = jnp.dtype(out_dtype).itemsize
    out = pl.pallas_call(
        _velocity_kernel,
        out_shape=jax.ShapeDtypeStruct((Bp, D), out_dtype),
        grid_spec=pltpu.PrefetchScalarGridSpec(
            num_scalar_prefetch=0,
            grid=grid,
            in_specs=[
                pl.BlockSpec((tb, D), lambda i: (i, 0)),   # x  (batch tile, f32)
                pl.BlockSpec((tb, Z), lambda i: (i, 0)),   # z  (batch tile, f32)
                pl.BlockSpec((tb, 1), lambda i: (i, 0)),   # t  (batch tile, f32)
                # Weights: constant index_map -> VMEM-resident across the grid.
                pl.BlockSpec((D, H), lambda i: (0, 0)),    # w1x (bf16)
                pl.BlockSpec((Z, H), lambda i: (0, 0)),    # w1z (bf16)
                pl.BlockSpec((1, H), lambda i: (0, 0)),    # w1t (f32)
                pl.BlockSpec((1, H), lambda i: (0, 0)),    # b1  (f32)
                pl.BlockSpec((H, D), lambda i: (0, 0)),    # w2  (bf16, sign folded)
                pl.BlockSpec((1, D), lambda i: (0, 0)),    # b2  (f32, sign folded)
            ],
            out_specs=pl.BlockSpec((tb, D), lambda i: (i, 0)),
        ),
        compiler_params=pltpu.CompilerParams(
            dimension_semantics=("parallel",),
            vmem_limit_bytes=_vmem_limit_bytes(tb, D, Z, H, out_bytes)),
    )(x, z, t, fused["w1x"], fused["w1z"], fused["w1t"], fused["b1"],
      fused["w2"], fused["b2"])
    return out if Bp == B else out[:B]


# Pure-JAX f32 reference (for correctness check only).
def velocity_model_ref(x, t, z, params, *, reverse=False):
    h_pre = (x @ params["w1x"] + z @ params["w1z"]
             + t * params["w1t"] + params["b1"])
    out = jnp.tanh(h_pre) @ params["w2"] + params["b2"]
    return -out if reverse else out


# ----------------------------------------------------------------------------
# Wrapper mirroring ConditionedVelocityModel.forward semantics.
# The -1 from `reverse` is folded into the velocity weights at construction,
# so __call__ is a single fused kernel invocation for both directions.
# ----------------------------------------------------------------------------
class ConditionedVelocityModel:
    def __init__(self, velocity_params, h, reverse: bool = False,
                 out_dtype=jnp.bfloat16):
        self.reverse = reverse
        self.h = h
        self.out_dtype = out_dtype
        self._fused = prepare_velocity_params(velocity_params, reverse=reverse)

    def __call__(self, t, x, h=None):
        # TODO(synk): PyTorch's `if not h:` is tensor truthiness (raises for
        # multi-element tensors, False only for None/empty); replicated here as
        # a None check for array conditioning.
        if h is None:
            h = self.h
        return velocity_model_pallas(x, t, h, self._fused,
                                     out_dtype=self.out_dtype)


def init_params(key, d, z, hidden):
    k1, k2, k3, k4 = jax.random.split(key, 4)
    scale1 = 1.0 / jnp.sqrt(jnp.float32(d + z + 1))
    scale2 = 1.0 / jnp.sqrt(jnp.float32(hidden))
    return {
        "w1x": jax.random.normal(k1, (d, hidden), jnp.float32) * scale1,
        "w1z": jax.random.normal(k2, (z, hidden), jnp.float32) * scale1,
        "w1t": jax.random.normal(k3, (1, hidden), jnp.float32) * scale1,
        "b1":  jnp.zeros((1, hidden), jnp.float32),
        "w2":  jax.random.normal(k4, (hidden, d), jnp.float32) * scale2,
        "b2":  jnp.zeros((1, d), jnp.float32),
    }


if __name__ == "__main__":
    # Small but lane-dense shapes: D = H = 128 (full vreg lanes). B = 64 is a
    # "tiny batch" per the heuristic -> one grid step with the full batch.
    B, D, Z, H = 64, 128, 64, 128

    key = jax.random.PRNGKey(0)
    kx, kt, kz, kp = jax.random.split(key, 4)

    x = jax.random.normal(kx, (B, D), jnp.float32)
    t = jax.random.uniform(kt, (B, 1), jnp.float32)
    h_cond = jax.random.normal(kz, (B, Z), jnp.float32)
    params = init_params(kp, D, Z, H)

    fwd_model = ConditionedVelocityModel(params, h_cond, reverse=False)
    rev_model = ConditionedVelocityModel(params, h_cond, reverse=True)

    out_fwd = jax.block_until_ready(fwd_model(t, x))            # uses self.h
    out_rev = jax.block_until_ready(rev_model(t, x, h_cond))    # explicit h

    ref_fwd = velocity_model_ref(x, t, h_cond, params, reverse=False)
    ref_rev = velocity_model_ref(x, t, h_cond, params, reverse=True)

    assert out_fwd.shape == (B, D) and out_fwd.dtype == jnp.bfloat16
    assert out_rev.shape == (B, D)
    # bf16 MXU inputs / bf16 output with f32 accumulation vs pure-f32 reference.
    assert jnp.allclose(out_fwd.astype(jnp.float32), ref_fwd, atol=4e-2, rtol=4e-2)
    assert jnp.allclose(out_rev.astype(jnp.float32), ref_rev, atol=4e-2, rtol=4e-2)
    # Sign folding is exact: reverse output is exactly the negated forward.
    assert jnp.allclose(out_rev.astype(jnp.float32),
                        -out_fwd.astype(jnp.float32), atol=1e-6, rtol=0.0)

    # f32-output path (for precision-sensitive ODE integrators) also works.
    out_f32 = jax.block_until_ready(
        velocity_model_pallas(x, t, h_cond, fwd_model._fused,
                              out_dtype=jnp.float32))
    assert out_f32.dtype == jnp.float32
    assert jnp.allclose(out_f32, ref_fwd, atol=4e-2, rtol=4e-2)

    print("KERNEL_OK")
</pallas_src>

<mosaic_0001>
module attributes {stable_mosaic.version = 11 : i64} {
  func.func @_velocity_kernel(%arg0: i32, %arg1: memref<64x128xf32, #tpu.memory_space<vmem>>, %arg2: memref<64x64xf32, #tpu.memory_space<vmem>>, %arg3: memref<64x1xf32, #tpu.memory_space<vmem>>, %arg4: memref<128x128xbf16, #tpu.memory_space<vmem>>, %arg5: memref<64x128xbf16, #tpu.memory_space<vmem>>, %arg6: memref<1x128xf32, #tpu.memory_space<vmem>>, %arg7: memref<1x128xf32, #tpu.memory_space<vmem>>, %arg8: memref<128x128xbf16, #tpu.memory_space<vmem>>, %arg9: memref<1x128xf32, #tpu.memory_space<vmem>>, %arg10: memref<64x128xbf16, #tpu.memory_space<vmem>>) attributes {dimension_semantics = [#tpu.dimension_semantics<parallel>], iteration_bounds = array<i64: 1>, scalar_prefetch = 0 : i64, scratch_operands = 0 : i64, tpu.core_type = #tpu.core_type<tc>, window_params = [{transform_indices = @transform_0, window_bounds = array<i64: 64, 128>}, {transform_indices = @transform_1, window_bounds = array<i64: 64, 64>}, {transform_indices = @transform_2, window_bounds = array<i64: 64, 1>}, {pipeline_mode = #tpu.pipeline_mode<synchronous>, transform_indices = @transform_3, window_bounds = array<i64: 128, 128>}, {pipeline_mode = #tpu.pipeline_mode<synchronous>, transform_indices = @transform_4, window_bounds = array<i64: 64, 128>}, {pipeline_mode = #tpu.pipeline_mode<synchronous>, transform_indices = @transform_5, window_bounds = array<i64: 1, 128>}, {pipeline_mode = #tpu.pipeline_mode<synchronous>, transform_indices = @transform_6, window_bounds = array<i64: 1, 128>}, {pipeline_mode = #tpu.pipeline_mode<synchronous>, transform_indices = @transform_7, window_bounds = array<i64: 128, 128>}, {pipeline_mode = #tpu.pipeline_mode<synchronous>, transform_indices = @transform_8, window_bounds = array<i64: 1, 128>}, {transform_indices = @transform_9, window_bounds = array<i64: 64, 128>}]} {
    %c0 = arith.constant 0 : index
    %c0_0 = arith.constant 0 : index
    %0 = vector.load %arg1[%c0, %c0_0] : memref<64x128xf32, #tpu.memory_space<vmem>>, vector<64x128xf32>
    %1 = arith.truncf %0 : vector<64x128xf32> to vector<64x128xbf16>
    %c0_1 = arith.constant 0 : index
    %c0_2 = arith.constant 0 : index
    %2 = vector.load %arg2[%c0_1, %c0_2] : memref<64x64xf32, #tpu.memory_space<vmem>>, vector<64x64xf32>
    %3 = arith.truncf %2 : vector<64x64xf32> to vector<64x64xbf16>
    %c0_3 = arith.constant 0 : index
    %c0_4 = arith.constant 0 : index
    %4 = vector.load %arg4[%c0_3, %c0_4] : memref<128x128xbf16, #tpu.memory_space<vmem>>, vector<128x128xbf16>
    %cst = arith.constant dense<0.000000e+00> : vector<64x128xf32>
    %5 = tpu.matmul %1, %4, %cst {dimension_numbers = #tpu.dot_dimension_numbers<[1], [0], [0], [1], [0, 0, 1, 1], [], []>} : vector<64x128xbf16>, vector<128x128xbf16>, vector<64x128xf32> -> vector<64x128xf32>
    %c0_5 = arith.constant 0 : index
    %c0_6 = arith.constant 0 : index
    %6 = vector.load %arg5[%c0_5, %c0_6] : memref<64x128xbf16, #tpu.memory_space<vmem>>, vector<64x128xbf16>
    %cst_7 = arith.constant dense<0.000000e+00> : vector<64x128xf32>
    %7 = tpu.matmul %3, %6, %cst_7 {dimension_numbers = #tpu.dot_dimension_numbers<[1], [0], [0], [1], [0, 0, 1, 1], [], []>} : vector<64x64xbf16>, vector<64x128xbf16>, vector<64x128xf32> -> vector<64x128xf32>
    %8 = arith.addf %5, %7 : vector<64x128xf32>
    %c0_8 = arith.constant 0 : index
    %c0_9 = arith.constant 0 : index
    %9 = vector.load %arg3[%c0_8, %c0_9] : memref<64x1xf32, #tpu.memory_space<vmem>>, vector<64x1xf32>
    %c0_10 = arith.constant 0 : index
    %c0_11 = arith.constant 0 : index
    %10 = vector.load %arg6[%c0_10, %c0_11] : memref<1x128xf32, #tpu.memory_space<vmem>>, vector<1x128xf32>
    %11 = vector.broadcast %9 : vector<64x1xf32> to vector<64x128xf32>
    %12 = vector.broadcast %10 : vector<1x128xf32> to vector<64x128xf32>
    %13 = arith.mulf %11, %12 : vector<64x128xf32>
    %14 = arith.addf %8, %13 : vector<64x128xf32>
    %c0_12 = arith.constant 0 : index
    %c0_13 = arith.constant 0 : index
    %15 = vector.load %arg7[%c0_12, %c0_13] : memref<1x128xf32, #tpu.memory_space<vmem>>, vector<1x128xf32>
    %16 = vector.broadcast %15 : vector<1x128xf32> to vector<64x128xf32>
    %17 = arith.addf %14, %16 : vector<64x128xf32>
    %18 = math.tanh %17 : vector<64x128xf32>
    %19 = arith.truncf %18 : vector<64x128xf32> to vector<64x128xbf16>
    %c0_14 = arith.constant 0 : index
    %c0_15 = arith.constant 0 : index
    %20 = vector.load %arg8[%c0_14, %c0_15] : memref<128x128xbf16, #tpu.memory_space<vmem>>, vector<128x128xbf16>
    %cst_16 = arith.constant dense<0.000000e+00> : vector<64x128xf32>
    %21 = tpu.matmul %19, %20, %cst_16 {dimension_numbers = #tpu.dot_dimension_numbers<[1], [0], [0], [1], [0, 0, 1, 1], [], []>} : vector<64x128xbf16>, vector<128x128xbf16>, vector<64x128xf32> -> vector<64x128xf32>
    %c0_17 = arith.constant 0 : index
    %c0_18 = arith.constant 0 : index
    %22 = vector.load %arg9[%c0_17, %c0_18] : memref<1x128xf32, #tpu.memory_space<vmem>>, vector<1x128xf32>
    %23 = vector.broadcast %22 : vector<1x128xf32> to vector<64x128xf32>
    %24 = arith.addf %21, %23 : vector<64x128xf32>
    %25 = arith.truncf %24 : vector<64x128xf32> to vector<64x128xbf16>
    %c0_19 = arith.constant 0 : index
    %c0_20 = arith.constant 0 : index
    %26 = vector.load %arg10[%c0_19, %c0_20] : memref<64x128xbf16, #tpu.memory_space<vmem>>, vector<64x128xbf16>
    tpu.vector_store %arg10[%c0_19, %c0_20], %25 {strides = array<i32>} : memref<64x128xbf16, #tpu.memory_space<vmem>>, vector<64x128xbf16>,
    return
  }
  func.func @transform_0(%arg0: i32) -> (i32, i32) {
    %c0_i32 = arith.constant 0 : i32
    %c0_i32_0 = arith.constant 0 : i32
    return %arg0, %c0_i32 : i32, i32
  }
  func.func @transform_1(%arg0: i32) -> (i32, i32) {
    %c0_i32 = arith.constant 0 : i32
    %c0_i32_0 = arith.constant 0 : i32
    return %arg0, %c0_i32 : i32, i32
  }
  func.func @transform_2(%arg0: i32) -> (i32, i32) {
    %c0_i32 = arith.constant 0 : i32
    %c0_i32_0 = arith.constant 0 : i32
    return %arg0, %c0_i32 : i32, i32
  }
  func.func @transform_3(%arg0: i32) -> (i32, i32) {
    %c0_i32 = arith.constant 0 : i32
    %c0_i32_0 = arith.constant 0 : i32
    %c0_i32_1 = arith.constant 0 : i32
    return %c0_i32, %c0_i32_0 : i32, i32
  }
  func.func @transform_4(%arg0: i32) -> (i32, i32) {
    %c0_i32 = arith.constant 0 : i32
    %c0_i32_0 = arith.constant 0 : i32
    %c0_i32_1 = arith.constant 0 : i32
    return %c0_i32, %c0_i32_0 : i32, i32
  }
  func.func @transform_5(%arg0: i32) -> (i32, i32) {
    %c0_i32 = arith.constant 0 : i32
    %c0_i32_0 = arith.constant 0 : i32
    %c0_i32_1 = arith.constant 0 : i32
    return %c0_i32, %c0_i32_0 : i32, i32
  }
  func.func @transform_6(%arg0: i32) -> (i32, i32) {
    %c0_i32 = arith.constant 0 : i32
    %c0_i32_0 = arith.constant 0 : i32
    %c0_i32_1 = arith.constant 0 : i32
    return %c0_i32, %c0_i32_0 : i32, i32
  }
  func.func @transform_7(%arg0: i32) -> (i32, i32) {
    %c0_i32 = arith.constant 0 : i32
    %c0_i32_0 = arith.constant 0 : i32
    %c0_i32_1 = arith.constant 0 : i32
    return %c0_i32, %c0_i32_0 : i32, i32
  }
  func.func @transform_8(%arg0: i32) -> (i32, i32) {
    %c0_i32 = arith.constant 0 : i32
    %c0_i32_0 = arith.constant 0 : i32
    %c0_i32_1 = arith.constant 0 : i32
    return %c0_i32, %c0_i32_0 : i32, i32
  }
  func.func @transform_9(%arg0: i32) -> (i32, i32) {
    %c0_i32 = arith.constant 0 : i32
    %c0_i32_0 = arith.constant 0 : i32
    return %arg0, %c0_i32 : i32, i32
  }
}

</mosaic_0001>

<bundles_post_ra>
// kernel: velocity_model_pallas.1
= control target key start
LH: loop header
LB: loop body
LE: loop exit
PB: predicated region body
PF: predicated region fallthrough
CT: control target
= control target key end

     0   :  { %14 = vsyncpa [#allocation3], 0  ;;  %s1181_s0 = inlined_call_operand.vmem [shape: f32[64,128], index: 0, kind: input, shape index: {}]   ;;  %s1182_s1 = inlined_call_operand.hbm [shape: f32[64,64], index: 1, kind: input, shape index: {}]   ;;  %s1183_s2 = inlined_call_operand.vmem [shape: f32[64,1], index: 2, kind: input, shape index: {}]   ;;  %s1184_s3 = inlined_call_operand.hbm [shape: bf16[128,128], index: 3, kind: input, shape index: {}]   ;;  %s1185_s4 = inlined_call_operand.hbm [shape: bf16[64,128], index: 4, kind: input, shape index: {}]   ;;  %s1186_s5 = inlined_call_operand.vmem [shape: f32[1,128], index: 5, kind: input, shape index: {}]   ;;  %s1187_s6 = inlined_call_operand.vmem [shape: f32[1,128], index: 6, kind: input, shape index: {}]   ;;  %s1188_s7 = inlined_call_operand.hbm [shape: bf16[128,128], index: 7, kind: input, shape index: {}]   ;;  %s1189_s8 = inlined_call_operand.vmem [shape: f32[1,128], index: 8, kind: input, shape index: {}]   ;;  %s1190_s9 = inlined_call_operand.hbm [shape: bf16[64,128], index: 9, kind: output, shape index: {}]  }
   0x1   :  { %15 = vsyncpa [#allocation6], 0 }
   0x2   :  { %16 = vsyncpa [#allocation9], 0 }
   0x3   :  { %17 = vsyncpa [#allocation4], 0  ;;  %s981_s30 = smov [#allocation5]   ;;  %s863_s13 = scalar_lea.hbm %s1184_s3, 1024 }
   0x4   :  { %s39_s10 = sshll.u32 %s981_s30, 4  ;;  %p864_p0 = scmp.ne.s32.totalorder %s1184_s3, %s863_s13  ;;  %s40_s10 = int_to_ptr.vmem [resolvable:$true] %s39_s10 }
   0x5   :  { %p867_p1 = scmp.lt.u32.totalorder %s863_s13, %s1184_s3 }
   0x7   :  { %p869_p2 = pnand %p867_p1, %p864_p0 }
   0x9   :  { %872 = shalt.err (!%p869_p2)
}
   0xa   :  { %s873_s18 = scalar_lea.vmem %s40_s10, 1024  ;;  %p878_p4 = scmp.lt.s32.totalorder %s40_s10, %s40_s10 }
   0xb   :  { %p874_p3 = scmp.ne.s32.totalorder %s40_s10, %s873_s18  ;;  %p879_p5 = scmp.lt.s32.totalorder %s873_s18, %s873_s18 }
   0xd   :  { %p880_p6 = por %p879_p5, %p878_p4 }
   0xf   :  { %p881_p7 = pnand %p880_p6, %p874_p3 }
  0x11   :  { %884 = shalt.err (!%p881_p7)
}
  0x12   :  { %s982_s19 = smov 64   ;;  %s983_s20 = smov 4  }
  0x13   :  { %45 = dma.hbm_to_vmem [thread:$0]  %s1184_s3, 1024, %s40_s10, [#allocation6], %s982_s19, %s982_s19, %s983_s20  }
  0x14   :  { %s984_s23 = smov [#allocation2]   ;;  %s885_s27 = scalar_lea.hbm %s1182_s1, 1024 }
  0x15   :  { %s25_s24 = sshll.u32 %s984_s23, 4  ;;  %p886_p8 = scmp.ne.s32.totalorder %s1182_s1, %s885_s27  ;;  %s26_s24 = int_to_ptr.vmem [resolvable:$true] %s25_s24 }
  0x16   :  { %p889_p9 = scmp.lt.u32.totalorder %s885_s27, %s1182_s1 }
  0x18   :  { %p891_p10 = pnand %p889_p9, %p886_p8 }
  0x1a   :  { %894 = shalt.err (!%p891_p10)
}
  0x1b   :  { %s895_s12 = scalar_lea.vmem %s26_s24, 1024  ;;  %p900_p12 = scmp.lt.s32.totalorder %s26_s24, %s26_s24 }
  0x1c   :  { %p896_p11 = scmp.ne.s32.totalorder %s26_s24, %s895_s12  ;;  %p901_p13 = scmp.lt.s32.totalorder %s895_s12, %s895_s12 }
  0x1e   :  { %p902_p0 = por %p901_p13, %p900_p12 }
  0x20   :  { %p903_p1 = pnand %p902_p0, %p896_p11 }
  0x22   :  { %906 = shalt.err (!%p903_p1)
}
  0x23   :  { %s985_s3 = smov 128   ;;  %s986_s10 = smov 8  }
  0x24   :  { %31 = dma.hbm_to_vmem [thread:$0]  %s1182_s1, 1024, %s26_s24, [#allocation3], %s985_s3, %s985_s3, %s986_s10  }
  0x25   :  { %s987_s15 = smov [#allocation7]   ;;  %s988_s17 = smov [#allocation8]  }
  0x26   :  { %s51_s16 = sshll.u32 %s987_s15, 4  ;;  %s67_s18 = sshll.u32 %s988_s17, 4  ;;  %s52_s16 = int_to_ptr.vmem [resolvable:$true] %s51_s16  ;;  %s1068_s18 = int_to_ptr.vmem [resolvable:$true] %s67_s18 }
  0x27   :  { %s907_s23 = scalar_lea.hbm %s1185_s4, 512 }
  0x28   :  { %p908_p2 = scmp.ne.s32.totalorder %s1185_s4, %s907_s23  ;;  %p911_p3 = scmp.lt.u32.totalorder %s907_s23, %s1185_s4 }
  0x2a   :  { %p913_p4 = pnand %p911_p3, %p908_p2 }
  0x2c   :  { %916 = shalt.err (!%p913_p4)
}
  0x2d   :  { %s917_s1 = scalar_lea.vmem %s52_s16, 512  ;;  %p922_p6 = scmp.lt.s32.totalorder %s52_s16, %s52_s16 }
  0x2e   :  { %p918_p5 = scmp.ne.s32.totalorder %s52_s16, %s917_s1  ;;  %p923_p7 = scmp.lt.s32.totalorder %s917_s1, %s917_s1 }
  0x30   :  { %p924_p8 = por %p923_p7, %p922_p6 }
  0x32   :  { %p925_p9 = pnand %p924_p8, %p918_p5 }
  0x34   :  { %928 = shalt.err (!%p925_p9)
}
  0x35   :  { %57 = dma.hbm_to_vmem [thread:$0]  %s1185_s4, 512, %s52_s16, [#allocation6], %s982_s19, %s982_s19, %s983_s20  }
  0x36   :  { %s929_s12 = scalar_lea.hbm %s1188_s7, 1024 }
  0x37   :  { %p930_p10 = scmp.ne.s32.totalorder %s1188_s7, %s929_s12  ;;  %p933_p11 = scmp.lt.u32.totalorder %s929_s12, %s1188_s7 }
  0x39   :  { %p935_p12 = pnand %p933_p11, %p930_p10 }
  0x3b   :  { %938 = shalt.err (!%p935_p12)
}
  0x3c   :  { %s939_s15 = scalar_lea.vmem %s1068_s18, 1024  ;;  %p944_p0 = scmp.lt.s32.totalorder %s1068_s18, %s1068_s18 }
  0x3d   :  { %p940_p13 = scmp.ne.s32.totalorder %s1068_s18, %s939_s15  ;;  %p945_p1 = scmp.lt.s32.totalorder %s939_s15, %s939_s15 }
  0x3f   :  { %p946_p2 = por %p945_p1, %p944_p0 }
  0x41   :  { %p947_p3 = pnand %p946_p2, %p940_p13 }
  0x43   :  { %950 = shalt.err (!%p947_p3)
}
  0x44   :  { %73 = dma.hbm_to_vmem [thread:$0]  %s1188_s7, 1024, %s1068_s18, [#allocation9], %s982_s19, %s982_s19, %s983_s20  }
  0x45   :  { %973 = dma.done.wait [#allocation3], 1024  }
  0x46   :  { %974 = vsyncadd [#allocation3], 4294966272 }
  0x47   :  { %975 = dma.done.wait [#allocation6], 1536  }
  0x48   :  { %976 = vsyncadd [#allocation6], 4294965760 }
  0x49   :  { %977 = dma.done.wait [#allocation9], 1024  }
  0x4a   :  { %978 = vsyncadd [#allocation9], 4294966272  ;;  %v989_v0 = vmov 0   ;;  %v827_v1 = vld [vmem:[#allocation7] sm:$0xff]   ;;  %v828_v2 = vld [vmem:[#allocation7 + $0x8] sm:$0xff]   ;;  %vm161_vm0 = vcmask 523264  }
  0x4b   :  { %825 = vset.pattern.permute.xlu0 %v989_v0  ;;  %826 = vset.pattern.permute.xlu1 %v989_v0  ;;  %v829_v3 = vld [vmem:[#allocation7 + $0x10] sm:$0xff]   ;;  %v101_v4 = vld [vmem:[#allocation2] sm:$0xff]  ;;  %v102_v5 = vld [vmem:[#allocation2 + $0x8] sm:$0xff]  ;;  %s990_s24 = smov [#allocation10]  }
  0x4c   :  { %743 = vmatprep.subr.bf16.mxu0 %v827_v1  ;;  %v109_v6 = vpack.c.bf16 %v102_v5, %v101_v4  ;;  %v830_v7 = vld [vmem:[#allocation7 + $0x18] sm:$0xff]   ;;  %v831_v8 = vld [vmem:[#allocation5] sm:$0xff]   ;;  %v103_v9 = vld [vmem:[#allocation2 + $0x10] sm:$0xff]  ;;  %s631_s29 = sshll.u32 %s990_s24, 4  ;;  %s632_s29 = int_to_ptr.vmem [resolvable:$true] %s631_s29 }
  0x4d   :  { %744 = vmatpush3.bf16.msra.mxu0 %v827_v1  ;;  %v104_v10 = vld [vmem:[#allocation2 + $0x18] sm:$0xff]  ;;  %v105_v11 = vld [vmem:[#allocation2 + $0x20] sm:$0xff]  ;;  %v106_v12 = vld [vmem:[#allocation2 + $0x28] sm:$0xff]  ;;  %p956_p5 = scmp.lt.s32.totalorder %s632_s29, %s632_s29 }
  0x4e   :  { %745 = vmatprep.subr.bf16.mxu0 %v828_v2  ;;  %751 = vmatprep.mubr.msk.bf16.mxu0 %vm161_vm0, %v109_v6  ;;  %v110_v13 = vpack.c.bf16 %v104_v10, %v103_v9  ;;  %v111_v14 = vpack.c.bf16 %v106_v12, %v105_v11  ;;  %v832_v15 = vld [vmem:[#allocation5 + $0x8] sm:$0xff]   ;;  %v352_v16 = vld [vmem:[%s1183_s2] sm:$0xff]  ;;  %v354_v17 = vld [vmem:[%s1183_s2 + $0x10] sm:$0xff] }
  0x4f   :  { %v833_v18 = vld [vmem:[#allocation5 + $0x10] sm:$0xff]   ;;  %v108_v20 = vld [vmem:[#allocation2 + $0x38] sm:$0xff]  ;;  %363 = vperm.xlu0 %825, %v352_v16   ;;  %v89_v21 = vld [vmem:[%s1181_s0] sm:$0xff]  ;;  %373 = vperm.xlu1 %826, %v354_v17  }
  0x50   :  { %v107_v19 = vld [vmem:[#allocation2 + $0x30] sm:$0xff]  ;;  %v90_v22 = vld [vmem:[%s1181_s0 + $0x8] sm:$0xff]  ;;  %v355_v24 = vld [vmem:[%s1183_s2 + $0x18] sm:$0xff] }
  0x51   :  { %746 = vmatpush3.bf16.msra.mxu0 %v828_v2  ;;  %v353_v23 = vld [vmem:[%s1183_s2 + $0x8] sm:$0xff]  ;;  %v356_v25 = vld [vmem:[%s1183_s2 + $0x20] sm:$0xff]  ;;  %v834_v26 = vld [vmem:[#allocation5 + $0x18] sm:$0xff]   ;;  %v112_v27 = vpack.c.bf16 %v108_v20, %v107_v19  ;;  %v97_v29 = vpack.c.bf16 %v90_v22, %v89_v21 }
  0x52   :  { %747 = vmatprep.subr.bf16.mxu0 %v829_v3  ;;  %v839_v28 = vld [vmem:[#allocation8] sm:$0xff]   ;;  %v357_v30 = vld [vmem:[%s1183_s2 + $0x28] sm:$0xff]  ;;  %v358_v32 = vld [vmem:[%s1183_s2 + $0x30] sm:$0xff] }
  0x53   :  { %368 = vperm.xlu0 %825, %v353_v23   ;;  %378 = vperm.xlu1 %826, %v355_v24   ;;  %v840_v31 = vld [vmem:[#allocation8 + $0x8] sm:$0xff]   ;;  %v835_v33 = vld [vmem:[#allocation5 + $0x20] sm:$0xff]   ;;  %v359_v34 = vld [vmem:[%s1183_s2 + $0x38] sm:$0xff] }
  0x54   :  { %783 = vmatprep.subr.bf16.mxu1 %v839_v28  ;;  %v841_v35 = vld [vmem:[#allocation8 + $0x10] sm:$0xff]   ;;  %v836_v36 = vld [vmem:[#allocation5 + $0x28] sm:$0xff]   ;;  %v838_v38 = vld [vmem:[#allocation5 + $0x38] sm:$0xff]  }
  0x55   :  { %748 = vmatpush3.bf16.msra.mxu0 %v829_v3  ;;  %784 = vmatpush3.bf16.msra.mxu1 %v839_v28  ;;  %v837_v37 = vld [vmem:[#allocation5 + $0x30] sm:$0xff]   ;;  %v92_v40 = vld [vmem:[%s1181_s0 + $0x18] sm:$0xff]  ;;  %v93_v41 = vld [vmem:[%s1181_s0 + $0x20] sm:$0xff] }
  0x56   :  { %749 = vmatprep.subr.bf16.mxu0 %v830_v7  ;;  %785 = vmatprep.subr.bf16.mxu1 %v840_v31  ;;  %v91_v39 = vld [vmem:[%s1181_s0 + $0x10] sm:$0xff]  ;;  %v94_v42 = vld [vmem:[%s1181_s0 + $0x28] sm:$0xff]  ;;  %v96_v46 = vld [vmem:[%s1181_s0 + $0x38] sm:$0xff] }
  0x57   :  { %383 = vperm.xlu0 %825, %v356_v25   ;;  %388 = vperm.xlu1 %826, %v357_v30   ;;  %v98_v43 = vpack.c.bf16 %v92_v40, %v91_v39  ;;  %v99_v44 = vpack.c.bf16 %v94_v42, %v93_v41  ;;  %v95_v45 = vld [vmem:[%s1181_s0 + $0x30] sm:$0xff]  ;;  %v842_v48 = vld [vmem:[#allocation8 + $0x18] sm:$0xff]   ;;  %v843_v49 = vld [vmem:[#allocation8 + $0x20] sm:$0xff]  }
  0x58   :  { %v100_v47 = vpack.c.bf16 %v96_v46, %v95_v45  ;;  %v844_v50 = vld [vmem:[#allocation8 + $0x28] sm:$0xff]   ;;  %v845_v51 = vld [vmem:[#allocation8 + $0x30] sm:$0xff]   ;;  %v846_v52 = vld [vmem:[#allocation8 + $0x38] sm:$0xff]  }
  0x59   :  { %750 = vmatpush3.bf16.msra.mxu0 %v830_v7  ;;  %786 = vmatpush3.bf16.msra.mxu1 %v840_v31  ;;  %v661_v56 = vld [vmem:[%s1186_s5] ss:$0 sm:$0xff] }
  0x5a   :  { %759 = vmatprep.subr.bf16.mxu0 %v831_v8  ;;  %787 = vmatprep.subr.bf16.mxu1 %v841_v35  ;;  %v662_v63 = vld [vmem:[%s1187_s6] ss:$0 sm:$0xff] }
  0x5b   :  { %393 = vperm.xlu0 %825, %v358_v32   ;;  %398 = vperm.xlu1 %826, %v359_v34  }
  0x5c   :  { %752 = vmatmul.mubr.msk.bf16.vlgmr.msra.gmra.mrb[0].mxu0 %vm161_vm0, %v110_v13 }
  0x5d   :  { %760 = vmatpush3.bf16.msra.mxu0 %v831_v8  ;;  %755 = vmatprep.mubr.msk.bf16.mxu0 %vm161_vm0, %v111_v14 }
  0x5e   :  { %761 = vmatprep.subr.bf16.mxu0 %v832_v15  ;;  %788 = vmatpush3.bf16.msra.mxu1 %v841_v35 }
  0x5f   :  { %789 = vmatprep.subr.bf16.mxu1 %v842_v48 }
  0x61   :  { %762 = vmatpush3.bf16.msra.mxu0 %v832_v15 }
  0x62   :  { %763 = vmatprep.subr.bf16.mxu0 %v833_v18  ;;  %790 = vmatpush3.bf16.msra.mxu1 %v842_v48 }
  0x63   :  { %791 = vmatprep.subr.bf16.mxu1 %v843_v49 }
  0x64   :  { %756 = vmatmul.mubr.msk.bf16.gmra.mrb[4].mxu0 %vm161_vm0, %v112_v27 }
  0x65   :  { %764 = vmatpush3.bf16.msra.mxu0 %v833_v18  ;;  %775 = vmatprep.mubr.bf16.mxu0 %v97_v29 }
  0x66   :  { %765 = vmatprep.subr.bf16.mxu0 %v834_v26  ;;  %792 = vmatpush3.bf16.msra.mxu1 %v843_v49 }
  0x67   :  { %793 = vmatprep.subr.bf16.mxu1 %v844_v50 }
  0x69   :  { %766 = vmatpush3.bf16.msra.mxu0 %v834_v26 }
  0x6a   :  { %767 = vmatprep.subr.bf16.mxu0 %v835_v33  ;;  %794 = vmatpush3.bf16.msra.mxu1 %v844_v50 }
  0x6b   :  { %795 = vmatprep.subr.bf16.mxu1 %v845_v51 }
  0x6d   :  { %768 = vmatpush3.bf16.msra.mxu0 %v835_v33 }
  0x6e   :  { %769 = vmatprep.subr.bf16.mxu0 %v836_v36  ;;  %796 = vmatpush3.bf16.msra.mxu1 %v845_v51 }
  0x6f   :  { %797 = vmatprep.subr.bf16.mxu1 %v846_v52 }
  0x71   :  { %770 = vmatpush3.bf16.msra.mxu0 %v836_v36 }
  0x72   :  { %771 = vmatprep.subr.bf16.mxu0 %v837_v37  ;;  %798 = vmatpush3.bf16.msra.mxu1 %v846_v52 }
  0x75   :  { %772 = vmatpush3.bf16.msra.mxu0 %v837_v37 }
  0x76   :  { %773 = vmatprep.subr.bf16.mxu0 %v838_v38 }
  0x79   :  { %774 = vmatpush3.bf16.msra.mxu0 %v838_v38 }
  0x7c   :  { %776 = vmatmul.mubr.bf16.vlgmr.msra.gmra.mrb[0].mxu0 %v98_v43 }
  0x7d   :  { %779 = vmatprep.mubr.bf16.mxu0 %v99_v44  ;;  %v663_v44 = vld [vmem:[%s1189_s8] ss:$0 sm:$0xff]  ;;  %s951_s8 = scalar_lea.vmem %s632_s29, 512 }
  0x7e   :  { %p952_p4 = scmp.ne.s32.totalorder %s632_s29, %s951_s8  ;;  %p957_p6 = scmp.lt.s32.totalorder %s951_s8, %s951_s8 }
  0x80   :  { %p958_p7 = por %p957_p6, %p956_p5 }
  0x82   :  { %p959_p8 = pnand %p958_p7, %p952_p4 }
  0x84   :  { %780 = vmatmul.mubr.bf16.gmra.mrb[4].mxu0 %v100_v47 }
  0xce   :  { %v364_v53 = vpop.permute.xlu0 %363  ;;  %v374_v54 = vpop.permute.xlu1 %373 }
  0xcf   :  { %v409_v58 = vmul.f32 %v661_v56, %v374_v54  ;;  %v407_v60 = vmul.f32 %v661_v56, %v364_v53 }
  0xd2   :  { %v369_v55 = vpop.permute.xlu0 %368  ;;  %v379_v57 = vpop.permute.xlu1 %378 }
  0xd3   :  { %v410_v0 = vmul.f32 %v661_v56, %v379_v57  ;;  %v408_v3 = vmul.f32 %v661_v56, %v369_v55 }
  0xd6   :  { %v384_v59 = vpop.permute.xlu0 %383  ;;  %v389_v61 = vpop.permute.xlu1 %388 }
  0xd7   :  { %v411_v16 = vmul.f32 %v661_v56, %v384_v59  ;;  %v412_v21 = vmul.f32 %v661_v56, %v389_v61 }
  0xda   :  { %v394_v9 = vpop.permute.xlu0 %393  ;;  %v399_v13 = vpop.permute.xlu1 %398 }
  0xdb   :  { %v413_v15 = vmul.f32 %v661_v56, %v394_v9  ;;  %v414_v18 = vmul.f32 %v661_v56, %v399_v13 }
 0x14f   :  { %v777_v62 = vpop.f32.mrb[0].mxu0 }
 0x150   :  { %v417_v1 = vadd.f32 %v777_v62, %v409_v58  ;;  %v321_v2 = vpop.f32.mrb[1].mxu0 }
 0x151   :  { %v415_v4 = vadd.f32 %v407_v60, %v321_v2  ;;  %v778_v5 = vpop.f32.mrb[2].mxu0 }
 0x152   :  { %v432_v6 = vadd.f32 %v662_v63, %v417_v1  ;;  %v418_v7 = vadd.f32 %v778_v5, %v410_v0  ;;  %v324_v8 = vpop.f32.mrb[3].mxu0 }
 0x153   :  { %v430_v10 = vadd.f32 %v662_v63, %v415_v4  ;;  %v416_v11 = vadd.f32 %v408_v3, %v324_v8 }
 0x154   :  { %847 = vtanh.f32 %v432_v6  ;;  %v433_v12 = vadd.f32 %v662_v63, %v418_v7 }
 0x155   :  { %849 = vtanh.f32 %v430_v10  ;;  %v431_v14 = vadd.f32 %v662_v63, %v416_v11 }
 0x156   :  { %851 = vtanh.f32 %v433_v12 }
 0x157   :  { %853 = vtanh.f32 %v431_v14  ;;  %v781_v17 = vpop.f32.mrb[4].mxu0 }
 0x158   :  { %v421_v19 = vadd.f32 %v781_v17, %v413_v15  ;;  %v337_v20 = vpop.f32.mrb[5].mxu0 }
 0x159   :  { %v419_v22 = vadd.f32 %v411_v16, %v337_v20  ;;  %v782_v23 = vpop.f32.mrb[6].mxu0 }
 0x15a   :  { %v436_v24 = vadd.f32 %v662_v63, %v421_v19  ;;  %v422_v25 = vadd.f32 %v782_v23, %v414_v18  ;;  %v340_v26 = vpop.f32.mrb[7].mxu0 }
 0x15b   :  { %v434_v27 = vadd.f32 %v662_v63, %v419_v22  ;;  %v420_v28 = vadd.f32 %v412_v21, %v340_v26 }
 0x15c   :  { %855 = vtanh.f32 %v436_v24  ;;  %v437_v29 = vadd.f32 %v662_v63, %v422_v25 }
 0x15d   :  { %857 = vtanh.f32 %v434_v27  ;;  %v435_v30 = vadd.f32 %v662_v63, %v420_v28 }
 0x15e   :  { %v848_v31 = vpop.eup %847  ;;  %859 = vtanh.f32 %v437_v29 }
 0x15f   :  { %v850_v32 = vpop.eup %849  ;;  %861 = vtanh.f32 %v435_v30 }
 0x160   :  { %v852_v33 = vpop.eup %851 }
 0x161   :  { %v854_v34 = vpop.eup %853  ;;  %v447_v35 = vpack.c.bf16 %v852_v33, %v848_v31 }
 0x162   :  { %v446_v36 = vpack.c.bf16 %v854_v34, %v850_v32 }
 0x164   :  { %799 = vmatprep.mubr.bf16.mxu1 %v446_v36 }
 0x165   :  { %800 = vmatmul.mubr.bf16.vlgmr.msra.gmra.mrb[0].mxu1 %v447_v35 }
 0x166   :  { %v856_v37 = vpop.eup %855 }
 0x167   :  { %v858_v38 = vpop.eup %857 }
 0x168   :  { %v860_v39 = vpop.eup %859 }
 0x169   :  { %v862_v40 = vpop.eup %861  ;;  %v449_v41 = vpack.c.bf16 %v860_v39, %v856_v37 }
 0x16a   :  { %v448_v42 = vpack.c.bf16 %v862_v40, %v858_v38 }
 0x16c   :  { %803 = vmatprep.mubr.bf16.mxu1 %v448_v42 }
 0x16d   :  { %804 = vmatmul.mubr.bf16.gmra.mrb[4].mxu1 %v449_v41 }
 0x238   :  { %v801_v43 = vpop.f32.mrb[0].mxu1 }
 0x239   :  { %v555_v45 = vpop.f32.mrb[1].mxu1  ;;  %v564_v47 = vadd.f32 %v801_v43, %v663_v44 }
 0x23a   :  { %v802_v46 = vpop.f32.mrb[2].mxu1  ;;  %v556_v50 = vadd.f32 %v663_v44, %v555_v45 }
 0x23b   :  { %v567_v48 = vadd.f32 %v802_v46, %v663_v44  ;;  %v558_v49 = vpop.f32.mrb[3].mxu1 }
 0x23c   :  { %v559_v51 = vadd.f32 %v663_v44, %v558_v49 }
 0x23d   :  { %v696_v52 = vpack.c.bf16 %v567_v48, %v564_v47 }
 0x23e   :  { %v691_v53 = vpack.c.bf16 %v559_v51, %v556_v50 }
 0x23f   :  { %708 = vst [vmem:[#allocation10 + $0x8] sm:$0xff] %v696_v52  }
 0x240   :  { %692 = vst [vmem:[#allocation10] sm:$0xff] %v691_v53   ;;  %v805_v54 = vpop.f32.mrb[4].mxu1 }
 0x241   :  { %v571_v55 = vpop.f32.mrb[5].mxu1  ;;  %v580_v57 = vadd.f32 %v805_v54, %v663_v44 }
 0x242   :  { %v806_v56 = vpop.f32.mrb[6].mxu1  ;;  %v572_v60 = vadd.f32 %v663_v44, %v571_v55 }
 0x243   :  { %v583_v58 = vadd.f32 %v806_v56, %v663_v44  ;;  %v574_v59 = vpop.f32.mrb[7].mxu1 }
 0x244   :  { %v575_v61 = vadd.f32 %v663_v44, %v574_v59 }
 0x245   :  { %v706_v62 = vpack.c.bf16 %v583_v58, %v580_v57 }
 0x246   :  { %v701_v63 = vpack.c.bf16 %v575_v61, %v572_v60 }
 0x247   :  { %710 = vst [vmem:[#allocation10 + $0x18] sm:$0xff] %v706_v62  }
 0x248   :  { %709 = vst [vmem:[#allocation10 + $0x10] sm:$0xff] %v701_v63  }
 0x249   :  { %962 = shalt.err (!%p959_p8)
}
 0x24a   :  { %s963_s12 = scalar_lea.hbm %s1190_s9, 512 }
 0x24b   :  { %p964_p9 = scmp.ne.s32.totalorder %s1190_s9, %s963_s12  ;;  %p967_p10 = scmp.lt.u32.totalorder %s963_s12, %s1190_s9 }
 0x24d   :  { %p969_p11 = pnand %p967_p10, %p964_p9 }
 0x24f   :  { %972 = shalt.err (!%p969_p11)
}
 0x250   :  { %637 = dma.vmem_to_hbm [thread:$0]  %s632_s29, 512, %s1190_s9, [#allocation4], %s982_s19, %s982_s19, %s983_s20  }
 0x251   :  { %979 = dma.done.wait [#allocation4], 512  }
 0x252   :  { %980 = vsyncadd [#allocation4], 4294966784 }
 0x253   :  { %641 = vsyncpa [#allocation3], 1 }
 0x254   :  { %642 = vsyncpa [#allocation6], 1 }
 0x255   :  { %643 = vsyncpa [#allocation9], 1 }
 0x256   :  { %644 = vsyncpa [#allocation4], 1 }

</bundles_post_ra>
